<compile_context>
chip_gen: v7x
topology: tpu7x:2x2x1
jax: 0.10.0
libtpu: 0.0.40
codegen_flags: <defaults>
</compile_context>

<pallas_src>
import jax
import jax.numpy as jnp
from jax.experimental import pallas as pl
from jax.experimental.pallas import tpu as pltpu


def _dma_identity_kernel(x_hbm_ref, o_hbm_ref, copy_sem):
    # One DMA descriptor: copy the whole input buffer to the output buffer.
    # No VMEM staging, no per-tile grid overhead.
    copy = pltpu.make_async_copy(x_hbm_ref, o_hbm_ref, copy_sem)
    copy.start()
    copy.wait()


def _pallas_identity_copy(x):
    """Identity copy of `x` via a single-descriptor DMA Pallas kernel."""
    return pl.pallas_call(
        _dma_identity_kernel,
        out_shape=jax.ShapeDtypeStruct(x.shape, x.dtype),
        in_specs=[pl.BlockSpec(memory_space=pl.ANY)],
        out_specs=pl.BlockSpec(memory_space=pl.ANY),
        scratch_shapes=[pltpu.SemaphoreType.DMA],
    )(x)


def nonrelation_forward(main_feats, ref_feats=None, target_main=None,
                        target_ref=None, original_preds=None, *,
                        force_kernel=False):
    """Pallas equivalent of NonRelaton.forward: returns (main_feats, {}).

    main_feats: NCHW array of any dtype. ref_feats and the remaining args are
    accepted for signature parity and ignored (as in the PyTorch module).

    By default this is a zero-cost pass-through (the optimal implementation of
    an identity op). Set force_kernel=True to route the identity through a
    Pallas single-DMA copy kernel (e.g. to keep an explicit kernel boundary).
    """
    del ref_feats, target_main, target_ref, original_preds  # unused, as in torch

    if not force_kernel:
        # Highest-value optimization: an identity op should cost nothing.
        return main_feats, {}

    return _pallas_identity_copy(main_feats), {}


if __name__ == "__main__":
    key = jax.random.PRNGKey(0)
    k1, k2 = jax.random.split(key)

    # Small NCHW feature maps, consistent with a detection-relation module.
    main_feats = jax.random.normal(k1, (2, 4, 16, 16), dtype=jnp.float32)
    ref_feats = jax.random.normal(k2, (2, 4, 16, 16), dtype=jnp.float32)

    # Default (optimal) path: pure pass-through, no kernel, no copy.
    out_fast, extras_fast = nonrelation_forward(main_feats, ref_feats)
    out_fast = jax.block_until_ready(out_fast)
    assert out_fast.shape == main_feats.shape
    assert out_fast.dtype == main_feats.dtype
    assert extras_fast == {}
    assert bool(jnp.all(out_fast == main_feats))

    # Kernel path: run the Pallas single-DMA identity kernel once.
    out_kernel, extras_kernel = nonrelation_forward(
        main_feats, ref_feats, force_kernel=True)
    out_kernel = jax.block_until_ready(out_kernel)

    assert out_kernel.shape == main_feats.shape
    assert out_kernel.dtype == main_feats.dtype
    assert extras_kernel == {}
    assert bool(jnp.all(out_kernel == main_feats))

    print("KERNEL_OK")
</pallas_src>

<mosaic_0001>
module attributes {stable_mosaic.version = 11 : i64} {
  func.func @_dma_identity_kernel(%arg0: memref<2x4x16x16xf32, #tpu.memory_space<any>>, %arg1: memref<2x4x16x16xf32, #tpu.memory_space<any>>, %arg2: memref<!tpu.dma_semaphore, #tpu.memory_space<semaphore_mem>>) attributes {dimension_semantics = [], scalar_prefetch = 0 : i64, scratch_operands = 1 : i64, tpu.core_type = #tpu.core_type<tc>} {
    tpu.enqueue_dma source(%arg0 : memref<2x4x16x16xf32, #tpu.memory_space<any>>) target(%arg1 : memref<2x4x16x16xf32, #tpu.memory_space<any>>) target_semaphore(%arg2 : memref<!tpu.dma_semaphore, #tpu.memory_space<semaphore_mem>>)
    tpu.wait_dma2 semaphore(%arg2 : memref<!tpu.dma_semaphore, #tpu.memory_space<semaphore_mem>>) src(%arg0 : memref<2x4x16x16xf32, #tpu.memory_space<any>>) dst(%arg1 : memref<2x4x16x16xf32, #tpu.memory_space<any>>)
    return
  }
}

</mosaic_0001>

<bundles_post_ra>
// kernel: tpu_custom_call.1
= control target key start
LH: loop header
LB: loop body
LE: loop exit
PB: predicated region body
PF: predicated region fallthrough
CT: control target
= control target key end

     0   :  { %s36_s6 = smov [#allocation2]   ;;  %s37_s7 = smov [#allocation3]   ;;  %s55_s0 = inlined_call_operand.hbm [shape: f32[2,4,16,16], index: 0, kind: input, shape index: {}]   ;;  %s56_s1 = inlined_call_operand.hbm [shape: f32[2,4,16,16], index: 1, kind: output, shape index: {}]  }
   0x1   :  { %s38_s8 = smov 0  }
   0x2   :  { %18 = dma.general %s55_s0, 2048, %s56_s1, %s36_s6, %s37_s7, [#allocation4], %s38_s8, 0  }
   0x3   :  { %34 = dma.done.wait [#allocation2], 2048 }
   0x4   :  { %35 = vsyncadd [#allocation2], 4294965248 }
   0x5   :  { %24 = vsyncmov [#allocation2] }
   0x8   :  { %s25_s13 = vpop.sfrf %24 }
   0x9   :  { %p30_p0 = scmp.ne.s32.totalorder %s25_s13, 0 }
   0xb   :  { %29 = shalt.err (%p30_p0)  }

</bundles_post_ra>
